<compile_context>
chip_gen: v7x
topology: tpu7x:2x2x1
jax: 0.10.0
libtpu: 0.0.40
codegen_flags: <defaults>
</compile_context>

<pallas_src>
import jax
import jax.numpy as jnp
from jax.experimental import pallas as pl
from jax.experimental.pallas import tpu as pltpu


def dgpn_kernel(x_ref, w1_ref, b1_ref, wl_ref, bl_ref, wf_ref, bf_ref,
                preds_ref, local_ref, acc_ref):
    l = pl.program_id(1)  # view index (inner "arbitrary"/reduction axis)

    # fc1 + ReLU for this (row-tile, view): (TN, n_in_p) @ (n_in_p, n_h_p)
    temp = jnp.dot(x_ref[...], w1_ref[...], preferred_element_type=jnp.float32)
    temp = jnp.maximum(temp + b1_ref[...], 0.0)

    # accumulate total_embedds across views (init on first view, no zero-store)
    @pl.when(l == 0)
    def _():
        acc_ref[...] = temp

    @pl.when(l > 0)
    def _():
        acc_ref[...] += temp

    # local head, pre-fused with csd^T: single (TN, n_h_p) @ (n_h_p, Cp) matmul
    local_ref[...] = (
        jnp.dot(temp.astype(wl_ref.dtype), wl_ref[...],
                preferred_element_type=jnp.float32) + bl_ref[...])

    # final head on the summed embedding, only on the last view
    @pl.when(l == pl.num_programs(1) - 1)
    def _():
        total = acc_ref[...]
        preds_ref[...] = (
            jnp.dot(total.astype(wf_ref.dtype), wf_ref[...],
                    preferred_element_type=jnp.float32) + bf_ref[...])


def _round_up(v, m):
    return (v + m - 1) // m * m


def _pad2(a, rows, cols):
    return jnp.pad(a, ((0, rows - a.shape[0]), (0, cols - a.shape[1])))


def dgpn_forward(x, w1, b1, wl, bl, wf, bf, csd, *, matmul_dtype=jnp.bfloat16):
    """x: [L, N, n_in]; weights in PyTorch layout [out, in]; csd: [C, n_h].

    Returns (preds [N, C], local_preds [L, N, C]) in f32.
    """
    L, N, n_in = x.shape
    n_h = w1.shape[0]
    C = csd.shape[0]

    # ---- wrapper-side algebraic fusion of the heads with csd^T -------------
    csdT = csd.T.astype(jnp.float32)                 # (n_h, C)
    w1t = w1.T.astype(jnp.float32)                   # (n_in, n_h)
    wl_csd = wl.T.astype(jnp.float32) @ csdT         # (n_h, C)
    wf_csd = wf.T.astype(jnp.float32) @ csdT         # (n_h, C)
    bl_csd = (bl.astype(jnp.float32) @ csdT).reshape(1, C)
    bf_csd = (bf.astype(jnp.float32) @ csdT).reshape(1, C)
    b1r = b1.astype(jnp.float32).reshape(1, n_h)

    # ---- padding to MXU-friendly / lane-dense shapes ------------------------
    n_in_p = _round_up(n_in, 128)
    n_h_p = _round_up(n_h, 128)
    Cp = _round_up(C, 128)                           # lane-dense output stores
    TN = min(256, _round_up(N, 8))                   # row tile (multiple of 8)
    N_p = _round_up(N, TN)
    num_n = N_p // TN

    x_p = jnp.pad(x.astype(jnp.float32),
                  ((0, 0), (0, N_p - N), (0, n_in_p - n_in))).astype(matmul_dtype)
    w1t_p = _pad2(w1t, n_in_p, n_h_p).astype(matmul_dtype)
    wl_csd_p = _pad2(wl_csd, n_h_p, Cp).astype(matmul_dtype)
    wf_csd_p = _pad2(wf_csd, n_h_p, Cp).astype(matmul_dtype)
    b1_p = _pad2(b1r, 1, n_h_p)                      # biases stay f32
    bl_p = _pad2(bl_csd, 1, Cp)
    bf_p = _pad2(bf_csd, 1, Cp)

    # ---- explicit VMEM budget (headroom below v7x's 64 MiB) -----------------
    mm_bytes = jnp.dtype(matmul_dtype).itemsize
    est = (2 * TN * n_in_p * mm_bytes                          # x tile (dbl-buf)
           + 2 * (n_in_p * n_h_p + 2 * n_h_p * Cp) * mm_bytes  # weights
           + 2 * (n_h_p + 2 * Cp) * 4                          # biases
           + 2 * 2 * TN * Cp * 4                               # preds + local outs
           + TN * n_h_p * 4)                                   # accumulator
    vmem_limit = int(min(max(2 * est + (2 << 20), 16 << 20), 48 << 20))
    vmem_limit = max(vmem_limit, est + (2 << 20))

    const2d = lambda n, l: (0, 0)

    preds_p, local_p = pl.pallas_call(
        dgpn_kernel,
        out_shape=(
            jax.ShapeDtypeStruct((N_p, Cp), jnp.float32),
            jax.ShapeDtypeStruct((L, N_p, Cp), jnp.float32),
        ),
        grid_spec=pltpu.PrefetchScalarGridSpec(
            num_scalar_prefetch=0,
            grid=(num_n, L),                                   # (rows, views)
            in_specs=[
                pl.BlockSpec((pl.Squeezed(), TN, n_in_p),
                             lambda n, l: (l, n, 0)),          # x (per view/tile)
                pl.BlockSpec((n_in_p, n_h_p), const2d),        # fc1 weight^T
                pl.BlockSpec((1, n_h_p), const2d),             # fc1 bias
                pl.BlockSpec((n_h_p, Cp), const2d),            # fused local head
                pl.BlockSpec((1, Cp), const2d),                # fused local bias
                pl.BlockSpec((n_h_p, Cp), const2d),            # fused final head
                pl.BlockSpec((1, Cp), const2d),                # fused final bias
            ],
            out_specs=[
                pl.BlockSpec((TN, Cp), lambda n, l: (n, 0)),   # preds (resident over l)
                pl.BlockSpec((pl.Squeezed(), TN, Cp),
                             lambda n, l: (l, n, 0)),          # local preds
            ],
            scratch_shapes=[pltpu.VMEM((TN, n_h_p), jnp.float32)],  # total_embedds
        ),
        compiler_params=pltpu.CompilerParams(
            dimension_semantics=("parallel", "arbitrary"),
            vmem_limit_bytes=vmem_limit),
    )(x_p, w1t_p, b1_p, wl_csd_p, bl_p, wf_csd_p, bf_p)

    return preds_p[:N, :C], local_p[:, :N, :C]


def xavier_uniform(key, fan_out, fan_in):
    bound = (6.0 / (fan_in + fan_out)) ** 0.5
    return jax.random.uniform(key, (fan_out, fan_in), jnp.float32, -bound, bound)


def reference_forward(x, w1, b1, wl, bl, wf, bf, csd):
    # plain-JAX reference mirroring the PyTorch module (eval mode)
    temps = jnp.maximum(jnp.einsum('lni,hi->lnh', x, w1) + b1, 0.0)
    local = jnp.einsum('lnh,oh->lno', temps, wl) + bl
    local_preds = jnp.einsum('lno,oc->lnc', local, csd.T)     # dot_sim(local, csd^T)
    total = temps.sum(axis=0)
    final = total @ wf.T + bf
    preds = final @ csd.T
    return preds, local_preds


if __name__ == "__main__":
    L, N, n_in, n_h, C = 3, 8, 32, 32, 8

    key = jax.random.PRNGKey(0)
    keys = jax.random.split(key, 8)

    x = jax.random.normal(keys[0], (L, N, n_in), jnp.float32)
    csd = jax.random.normal(keys[1], (C, n_h), jnp.float32)

    w1 = xavier_uniform(keys[2], n_h, n_in)
    wl = xavier_uniform(keys[3], n_h, n_h)
    wf = xavier_uniform(keys[4], n_h, n_h)
    b1 = jax.random.uniform(keys[5], (n_h,), jnp.float32, -0.1, 0.1)
    bl = jax.random.uniform(keys[6], (n_h,), jnp.float32, -0.1, 0.1)
    bf = jax.random.uniform(keys[7], (n_h,), jnp.float32, -0.1, 0.1)

    ref_preds, ref_local = reference_forward(x, w1, b1, wl, bl, wf, bf, csd)

    # f32 MXU path: tight check against the plain-JAX reference
    preds, local_preds = dgpn_forward(x, w1, b1, wl, bl, wf, bf, csd,
                                      matmul_dtype=jnp.float32)
    jax.block_until_ready((preds, local_preds))
    assert jnp.allclose(preds, ref_preds, atol=1e-3, rtol=1e-3)
    assert jnp.allclose(local_preds, ref_local, atol=1e-3, rtol=1e-3)

    # bf16 MXU operands + f32 accumulation (default fast path on v6e/v7x)
    preds_bf, local_bf = dgpn_forward(x, w1, b1, wl, bl, wf, bf, csd)
    jax.block_until_ready((preds_bf, local_bf))

    def rel_err(a, b):
        return float(jnp.linalg.norm(a - b) / (jnp.linalg.norm(b) + 1e-6))

    assert rel_err(preds_bf, ref_preds) < 1e-2
    assert rel_err(local_bf, ref_local) < 1e-2

    print("KERNEL_OK")
</pallas_src>

<mosaic_0001>
module attributes {stable_mosaic.version = 11 : i64} {
  func.func @dgpn_kernel(%arg0: i32, %arg1: i32, %arg2: memref<1x8x128xf32, #tpu.memory_space<vmem>>, %arg3: memref<128x128xf32, #tpu.memory_space<vmem>>, %arg4: memref<1x128xf32, #tpu.memory_space<vmem>>, %arg5: memref<128x128xf32, #tpu.memory_space<vmem>>, %arg6: memref<1x128xf32, #tpu.memory_space<vmem>>, %arg7: memref<128x128xf32, #tpu.memory_space<vmem>>, %arg8: memref<1x128xf32, #tpu.memory_space<vmem>>, %arg9: memref<8x128xf32, #tpu.memory_space<vmem>>, %arg10: memref<1x8x128xf32, #tpu.memory_space<vmem>>, %arg11: memref<8x128xf32, #tpu.memory_space<vmem>>) attributes {dimension_semantics = [#tpu.dimension_semantics<parallel>, #tpu.dimension_semantics<arbitrary>], iteration_bounds = array<i64: 1, 3>, scalar_prefetch = 0 : i64, scratch_operands = 1 : i64, tpu.core_type = #tpu.core_type<tc>, window_params = [{transform_indices = @transform_0, window_bounds = array<i64: 1, 8, 128>}, {pipeline_mode = #tpu.pipeline_mode<synchronous>, transform_indices = @transform_1, window_bounds = array<i64: 128, 128>}, {pipeline_mode = #tpu.pipeline_mode<synchronous>, transform_indices = @transform_2, window_bounds = array<i64: 1, 128>}, {pipeline_mode = #tpu.pipeline_mode<synchronous>, transform_indices = @transform_3, window_bounds = array<i64: 128, 128>}, {pipeline_mode = #tpu.pipeline_mode<synchronous>, transform_indices = @transform_4, window_bounds = array<i64: 1, 128>}, {pipeline_mode = #tpu.pipeline_mode<synchronous>, transform_indices = @transform_5, window_bounds = array<i64: 128, 128>}, {pipeline_mode = #tpu.pipeline_mode<synchronous>, transform_indices = @transform_6, window_bounds = array<i64: 1, 128>}, {transform_indices = @transform_7, window_bounds = array<i64: 8, 128>}, {transform_indices = @transform_8, window_bounds = array<i64: 1, 8, 128>}]} {
    %c0 = arith.constant 0 : index
    %c0_0 = arith.constant 0 : index
    %c0_1 = arith.constant 0 : index
    %0 = vector.load %arg2[%c0, %c0_0, %c0_1] : memref<1x8x128xf32, #tpu.memory_space<vmem>>, vector<1x8x128xf32>
    %1 = vector.shape_cast %0 : vector<1x8x128xf32> to vector<8x128xf32>
    %c0_2 = arith.constant 0 : index
    %c0_3 = arith.constant 0 : index
    %2 = vector.load %arg3[%c0_2, %c0_3] : memref<128x128xf32, #tpu.memory_space<vmem>>, vector<128x128xf32>
    %cst = arith.constant dense<0.000000e+00> : vector<8x128xf32>
    %3 = tpu.matmul %1, %2, %cst {dimension_numbers = #tpu.dot_dimension_numbers<[1], [0], [0], [1], [0, 0, 1, 1], [], []>} : vector<8x128xf32>, vector<128x128xf32>, vector<8x128xf32> -> vector<8x128xf32>
    %c0_4 = arith.constant 0 : index
    %c0_5 = arith.constant 0 : index
    %4 = vector.load %arg4[%c0_4, %c0_5] : memref<1x128xf32, #tpu.memory_space<vmem>>, vector<1x128xf32>
    %5 = vector.broadcast %4 : vector<1x128xf32> to vector<8x128xf32>
    %6 = arith.addf %3, %5 : vector<8x128xf32>
    %cst_6 = arith.constant 0.000000e+00 : f32
    %7 = vector.broadcast %cst_6 : f32 to vector<8x128xf32>
    %8 = arith.maximumf %6, %7 : vector<8x128xf32>
    %c0_i32 = arith.constant 0 : i32
    %9 = arith.cmpi eq, %arg1, %c0_i32 : i32
    %10 = arith.extui %9 : i1 to i32
    %c0_i32_7 = arith.constant 0 : i32
    %11 = arith.cmpi ne, %10, %c0_i32_7 : i32
    scf.if %11 {
      %c0_19 = arith.constant 0 : index
      %c0_20 = arith.constant 0 : index
      %26 = vector.load %arg11[%c0_19, %c0_20] : memref<8x128xf32, #tpu.memory_space<vmem>>, vector<8x128xf32>
      tpu.vector_store %arg11[%c0_19, %c0_20], %8 {strides = array<i32>} : memref<8x128xf32, #tpu.memory_space<vmem>>, vector<8x128xf32>,
    } else {
    }
    %c0_i32_8 = arith.constant 0 : i32
    %12 = arith.cmpi sgt, %arg1, %c0_i32_8 : i32
    %13 = arith.extui %12 : i1 to i32
    %c0_i32_9 = arith.constant 0 : i32
    %14 = arith.cmpi ne, %13, %c0_i32_9 : i32
    scf.if %14 {
      %c0_19 = arith.constant 0 : index
      %c0_20 = arith.constant 0 : index
      %26 = vector.load %arg11[%c0_19, %c0_20] : memref<8x128xf32, #tpu.memory_space<vmem>>, vector<8x128xf32>
      %27 = arith.addf %26, %8 : vector<8x128xf32>
      %c0_21 = arith.constant 0 : index
      %c0_22 = arith.constant 0 : index
      %28 = vector.load %arg11[%c0_21, %c0_22] : memref<8x128xf32, #tpu.memory_space<vmem>>, vector<8x128xf32>
      tpu.vector_store %arg11[%c0_21, %c0_22], %27 {strides = array<i32>} : memref<8x128xf32, #tpu.memory_space<vmem>>, vector<8x128xf32>,
    } else {
    }
    %c0_10 = arith.constant 0 : index
    %c0_11 = arith.constant 0 : index
    %15 = vector.load %arg5[%c0_10, %c0_11] : memref<128x128xf32, #tpu.memory_space<vmem>>, vector<128x128xf32>
    %cst_12 = arith.constant dense<0.000000e+00> : vector<8x128xf32>
    %16 = tpu.matmul %8, %15, %cst_12 {dimension_numbers = #tpu.dot_dimension_numbers<[1], [0], [0], [1], [0, 0, 1, 1], [], []>} : vector<8x128xf32>, vector<128x128xf32>, vector<8x128xf32> -> vector<8x128xf32>
    %c0_13 = arith.constant 0 : index
    %c0_14 = arith.constant 0 : index
    %17 = vector.load %arg6[%c0_13, %c0_14] : memref<1x128xf32, #tpu.memory_space<vmem>>, vector<1x128xf32>
    %18 = vector.broadcast %17 : vector<1x128xf32> to vector<8x128xf32>
    %19 = arith.addf %16, %18 : vector<8x128xf32>
    %c0_15 = arith.constant 0 : index
    %c0_16 = arith.constant 0 : index
    %c0_17 = arith.constant 0 : index
    %20 = vector.load %arg10[%c0_15, %c0_16, %c0_17] : memref<1x8x128xf32, #tpu.memory_space<vmem>>, vector<1x8x128xf32>
    %21 = vector.shape_cast %20 : vector<1x8x128xf32> to vector<8x128xf32>
    %22 = vector.shape_cast %19 : vector<8x128xf32> to vector<1x8x128xf32>
    tpu.vector_store %arg10[%c0_15, %c0_16, %c0_17], %22 {strides = array<i32>} : memref<1x8x128xf32, #tpu.memory_space<vmem>>, vector<1x8x128xf32>,
    %c2_i32 = arith.constant 2 : i32
    %23 = arith.cmpi eq, %arg1, %c2_i32 : i32
    %24 = arith.extui %23 : i1 to i32
    %c0_i32_18 = arith.constant 0 : i32
    %25 = arith.cmpi ne, %24, %c0_i32_18 : i32
    scf.if %25 {
      %c0_19 = arith.constant 0 : index
      %c0_20 = arith.constant 0 : index
      %26 = vector.load %arg11[%c0_19, %c0_20] : memref<8x128xf32, #tpu.memory_space<vmem>>, vector<8x128xf32>
      %c0_21 = arith.constant 0 : index
      %c0_22 = arith.constant 0 : index
      %27 = vector.load %arg7[%c0_21, %c0_22] : memref<128x128xf32, #tpu.memory_space<vmem>>, vector<128x128xf32>
      %cst_23 = arith.constant dense<0.000000e+00> : vector<8x128xf32>
      %28 = tpu.matmul %26, %27, %cst_23 {dimension_numbers = #tpu.dot_dimension_numbers<[1], [0], [0], [1], [0, 0, 1, 1], [], []>} : vector<8x128xf32>, vector<128x128xf32>, vector<8x128xf32> -> vector<8x128xf32>
      %c0_24 = arith.constant 0 : index
      %c0_25 = arith.constant 0 : index
      %29 = vector.load %arg8[%c0_24, %c0_25] : memref<1x128xf32, #tpu.memory_space<vmem>>, vector<1x128xf32>
      %30 = vector.broadcast %29 : vector<1x128xf32> to vector<8x128xf32>
      %31 = arith.addf %28, %30 : vector<8x128xf32>
      %c0_26 = arith.constant 0 : index
      %c0_27 = arith.constant 0 : index
      %32 = vector.load %arg9[%c0_26, %c0_27] : memref<8x128xf32, #tpu.memory_space<vmem>>, vector<8x128xf32>
      tpu.vector_store %arg9[%c0_26, %c0_27], %31 {strides = array<i32>} : memref<8x128xf32, #tpu.memory_space<vmem>>, vector<8x128xf32>,
    } else {
    }
    return
  }
  func.func @transform_0(%arg0: i32, %arg1: i32) -> (i32, i32, i32) {
    %c0_i32 = arith.constant 0 : i32
    %c0_i32_0 = arith.constant 0 : i32
    return %arg1, %arg0, %c0_i32 : i32, i32, i32
  }
  func.func @transform_1(%arg0: i32, %arg1: i32) -> (i32, i32) {
    %c0_i32 = arith.constant 0 : i32
    %c0_i32_0 = arith.constant 0 : i32
    %c0_i32_1 = arith.constant 0 : i32
    return %c0_i32, %c0_i32_0 : i32, i32
  }
  func.func @transform_2(%arg0: i32, %arg1: i32) -> (i32, i32) {
    %c0_i32 = arith.constant 0 : i32
    %c0_i32_0 = arith.constant 0 : i32
    %c0_i32_1 = arith.constant 0 : i32
    return %c0_i32, %c0_i32_0 : i32, i32
  }
  func.func @transform_3(%arg0: i32, %arg1: i32) -> (i32, i32) {
    %c0_i32 = arith.constant 0 : i32
    %c0_i32_0 = arith.constant 0 : i32
    %c0_i32_1 = arith.constant 0 : i32
    return %c0_i32, %c0_i32_0 : i32, i32
  }
  func.func @transform_4(%arg0: i32, %arg1: i32) -> (i32, i32) {
    %c0_i32 = arith.constant 0 : i32
    %c0_i32_0 = arith.constant 0 : i32
    %c0_i32_1 = arith.constant 0 : i32
    return %c0_i32, %c0_i32_0 : i32, i32
  }
  func.func @transform_5(%arg0: i32, %arg1: i32) -> (i32, i32) {
    %c0_i32 = arith.constant 0 : i32
    %c0_i32_0 = arith.constant 0 : i32
    %c0_i32_1 = arith.constant 0 : i32
    return %c0_i32, %c0_i32_0 : i32, i32
  }
  func.func @transform_6(%arg0: i32, %arg1: i32) -> (i32, i32) {
    %c0_i32 = arith.constant 0 : i32
    %c0_i32_0 = arith.constant 0 : i32
    %c0_i32_1 = arith.constant 0 : i32
    return %c0_i32, %c0_i32_0 : i32, i32
  }
  func.func @transform_7(%arg0: i32, %arg1: i32) -> (i32, i32) {
    %c0_i32 = arith.constant 0 : i32
    %c0_i32_0 = arith.constant 0 : i32
    return %arg0, %c0_i32 : i32, i32
  }
  func.func @transform_8(%arg0: i32, %arg1: i32) -> (i32, i32, i32) {
    %c0_i32 = arith.constant 0 : i32
    %c0_i32_0 = arith.constant 0 : i32
    return %arg1, %arg0, %c0_i32 : i32, i32, i32
  }
}

</mosaic_0001>

<bundles_post_ra>
// kernel: tpu_custom_call.1
= control target key start
LH: loop header
LB: loop body
LE: loop exit
PB: predicated region body
PF: predicated region fallthrough
CT: control target
= control target key end

     0   :  { %s1837_s0 = inlined_call_operand.hbm [shape: f32[3,8,128], index: 0, kind: input, shape index: {}]   ;;  %s1838_s1 = inlined_call_operand.hbm [shape: f32[128,128], index: 1, kind: input, shape index: {}]   ;;  %s1839_s2 = inlined_call_operand.vmem [shape: f32[1,128], index: 2, kind: input, shape index: {}]   ;;  %s1840_s3 = inlined_call_operand.hbm [shape: f32[128,128], index: 3, kind: input, shape index: {}]   ;;  %s1841_s4 = inlined_call_operand.vmem [shape: f32[1,128], index: 4, kind: input, shape index: {}]   ;;  %s1842_s5 = inlined_call_operand.hbm [shape: f32[128,128], index: 5, kind: input, shape index: {}]   ;;  %s1843_s6 = inlined_call_operand.vmem [shape: f32[1,128], index: 6, kind: input, shape index: {}]   ;;  %s1844_s7 = inlined_call_operand.hbm [shape: f32[8,128], index: 7, kind: output, shape index: {0}]   ;;  %s1845_s8 = inlined_call_operand.hbm [shape: f32[3,8,128], index: 8, kind: output, shape index: {1}]  }
   0x1   :  { %1855 = sst [smem:[#allocation21_spill]] %s1843_s6 }
   0x2   :  { %1856 = sst [smem:[#allocation22_spill]] %s1844_s7 }
   0x3   :  { %1857 = sst [smem:[#allocation23_spill]] %s1845_s8 }
   0x4   :  { %14 = vsyncpa [#allocation4], 0 }
   0x5   :  { %16 = vsyncpa [#allocation4 + $0x1], 0 }
   0x6   :  { %17 = vsyncpa [#allocation7], 0 }
   0x7   :  { %18 = vsyncpa [#allocation10], 0 }
   0x8   :  { %19 = vsyncpa [#allocation5], 0 }
   0x9   :  { %20 = vsyncpa [#allocation13], 0 }
   0xa   :  { %22 = vsyncpa [#allocation13 + $0x1], 0  ;;  %s1496_s27 = smov 0   ;;  %s1498_s28 = smov 0  }
   0xb   :  { %s1500_s29 = smov 0   ;;  %s1502_s30 = smov 0  }
   0xc   :  { %s1504_s9 = smov 0   ;;  %s1506_s10 = smov 0  }
   0xd LB: > { %1858 = sst [smem:[#allocation19_spill]] %s1415_s27  ;;  %s838_s11 = sadd.s32 4294967295, %s1435_s10   ;;  %s1435_s10 = sphi %s1506_s10, %s28_s10   ;;  %s1431_s9 = sphi %s1504_s9, %s1884_s9   ;;  %s1427_s30 = sphi %s1502_s30, %s1883_s30   ;;  %s1423_s29 = sphi %s1500_s29, %s1882_s29   ;;  %s1419_s28 = sphi %s1498_s28, %s1881_s28   ;;  %s1415_s27 = sphi %s1496_s27, %s1880_s27  }
   0xe   : > { %s839_s12 = sadd.s32 4294967294, %s1435_s10   ;;  %p62_p0 = scmp.ne.s32.totalorder %s1419_s28, %s1415_s27 }
   0xf   : > { %p1530_p1 = scmp.eq.s32.totalorder %s838_s11, 0  ;;  %p1534_p2 = scmp.eq.s32.totalorder %s838_s11, 2 }
  0x10   : > { %p246_p3 = scmp.eq.s32.totalorder %s839_s12, 2  ;;  %p840_p5 = scmp.ge.s32.totalorder %s1435_s10, 1 }
  0x11   : > { %s1859_s13 = scalar_select %p1530_p1, 1, 0 }
  0x12   : > { %s1860_s14 = scalar_select %p1534_p2, 1, 0 }
  0x13   : > { %p1540_p4 = por %p1530_p1, %p62_p0  ;;  %p1545_p6 = por %p246_p3, %p62_p0 }
  0x14   : > { %p253_p7 = scmp.lt.s32.totalorder %s1435_s10, 4  ;;  %s1437_s18 = smov [#allocation6]  }
  0x15   : > { %s1861_s15 = scalar_select %p1540_p4, 1, 0 }
  0x16   : > { %s1862_s16 = scalar_select %p1545_p6, 1, 0 }
  0x17   : > { %p1550_p8 = pnand %p840_p5, %p253_p7  ;;  %s265_s19 = sshll.u32 %s1437_s18, 4  ;;  %s1554_s19 = int_to_ptr.vmem [resolvable:$true] %s265_s19 }
  0x18   : > { %1863 = sst [smem:[#allocation20_spill]] %s1862_s16  ;;  %s1438_s21 = smov [#allocation8]  }
  0x19   : > { %s1864_s17 = scalar_select %p1550_p8, 1, 0 }
  0x1a   : > { %p1113_p9 = pneg %p1550_p8  ;;  %s281_s22 = sshll.u32 %s1438_s21, 4  ;;  %s1564_s22 = int_to_ptr.vmem [resolvable:$true] %s281_s22 }
  0x1b   : > { %s1439_s23 = smov [#allocation9]   ;;  %s1201_s11 = scalar_lea.hbm %s1838_s1, 2048 }
  0x1c   : > { %p1560_p10 = pnand %p1113_p9, %p1530_p1  ;;  %s1566_s24 = sshll.u32 %s1439_s23, 4  ;;  %s298_s24 = int_to_ptr.vmem [resolvable:$true] %s1566_s24 }
  0x1d   : > { %p1202_p11 = scmp.ne.s32.totalorder %s1838_s1, %s1201_s11  ;;  %p1208_p3 = scmp.lt.u32.totalorder %s1201_s11, %s1838_s1 }
  0x1e   : > { %p1576_p12 = pneg %p1560_p10 }
  0x20   : > { %p1204_p13 = pnand %p1576_p12, %p1202_p11 }
  0x22   : > { %p1205_p0 = pneg %p1204_p13 }
  0x24   : > { %p1210_p5 = pnand %p1208_p3, %p1205_p0 }
  0x26   : > { %1213 = shalt.err (!%p1210_p5)
}
  0x27   : > { %s1214_s25 = scalar_lea.vmem %s1554_s19, 2048  ;;  %p1222_p1 = scmp.lt.s32.totalorder %s1554_s19, %s1554_s19 }
  0x28   : > { %p1215_p7 = scmp.ne.s32.totalorder %s1554_s19, %s1214_s25  ;;  %p1223_p4 = scmp.lt.s32.totalorder %s1214_s25, %s1214_s25 }
  0x2a   : > { %p1217_p9 = pnand %p1215_p7, %p1576_p12  ;;  %p1224_p11 = por %p1223_p4, %p1222_p1 }
  0x2c   : > { %p1218_p6 = pneg %p1217_p9 }
  0x2e   : > { %p1225_p13 = pnand %p1224_p11, %p1218_p6 }
  0x30   : > { %1228 = shalt.err (!%p1225_p13)
}
  0x31   : > { %s1440_s26 = smov 128   ;;  %s1441_s11 = smov 8  }
  0x32   : > { %1116 = dma.hbm_to_vmem [thread:$0]  (!%p1560_p10), %s1838_s1, 2048, %s1554_s19, [#allocation7], %s1440_s26, %s1440_s26, %s1441_s11  }
  0x33   : > { %s1229_s25 = scalar_lea.hbm %s1840_s3, 2048 }
  0x34   : > { %p1230_p1 = scmp.ne.s32.totalorder %s1840_s3, %s1229_s25  ;;  %p1236_p0 = scmp.lt.u32.totalorder %s1229_s25, %s1840_s3 }
  0x36   : > { %p1232_p4 = pnand %p1230_p1, %p1576_p12 }
  0x38   : > { %p1233_p6 = pneg %p1232_p4 }
  0x3a   : > { %p1238_p3 = pnand %p1236_p0, %p1233_p6 }
  0x3c   : > { %1241 = shalt.err (!%p1238_p3)
}
  0x3d   : > { %s1242_s19 = scalar_lea.vmem %s1564_s22, 2048  ;;  %p1250_p11 = scmp.lt.s32.totalorder %s1564_s22, %s1564_s22 }
  0x3e   : > { %p1243_p5 = scmp.ne.s32.totalorder %s1564_s22, %s1242_s19  ;;  %p1251_p13 = scmp.lt.s32.totalorder %s1242_s19, %s1242_s19 }
  0x40   : > { %p1245_p7 = pnand %p1243_p5, %p1576_p12  ;;  %p1252_p1 = por %p1251_p13, %p1250_p11 }
  0x42   : > { %p1246_p9 = pneg %p1245_p7 }
  0x44   : > { %p1253_p4 = pnand %p1252_p1, %p1246_p9 }
  0x46   : > { %1256 = shalt.err (!%p1253_p4)
}
  0x47   : > { %1119 = dma.hbm_to_vmem [thread:$0]  (!%p1560_p10), %s1840_s3, 2048, %s1564_s22, [#allocation7], %s1440_s26, %s1440_s26, %s1441_s11  }
  0x48   : > { %s1257_s12 = scalar_lea.hbm %s1842_s5, 2048 }
  0x49   : > { %p1258_p6 = scmp.ne.s32.totalorder %s1842_s5, %s1257_s12  ;;  %p1264_p5 = scmp.lt.u32.totalorder %s1257_s12, %s1842_s5 }
  0x4b   : > { %p1260_p0 = pnand %p1258_p6, %p1576_p12 }
  0x4d   : > { %p1261_p3 = pneg %p1260_p0 }
  0x4f   : > { %p1266_p7 = pnand %p1264_p5, %p1261_p3 }
  0x51   : > { %1269 = shalt.err (!%p1266_p7)
}
  0x52   : > { %s1270_s19 = scalar_lea.vmem %s298_s24, 2048  ;;  %p1278_p1 = scmp.lt.s32.totalorder %s298_s24, %s298_s24 }
  0x53   : > { %p1271_p9 = scmp.ne.s32.totalorder %s298_s24, %s1270_s19  ;;  %p1279_p4 = scmp.lt.s32.totalorder %s1270_s19, %s1270_s19 }
  0x55   : > { %p1273_p11 = pnand %p1271_p9, %p1576_p12  ;;  %p1280_p8 = por %p1279_p4, %p1278_p1 }
  0x57   : > { %p1274_p13 = pneg %p1273_p11 }
  0x59   : > { %p1281_p2 = pnand %p1280_p8, %p1274_p13 }
  0x5b   : > { %1284 = shalt.err (!%p1281_p2)
}
  0x5c   : > { %1122 = dma.hbm_to_vmem [thread:$0]  (!%p1560_p10), %s1842_s5, 2048, %s298_s24, [#allocation10], %s1440_s26, %s1440_s26, %s1441_s11  }
  0x5d   : > { %s49_s16 = sadd.s32 1, %s1423_s29  ;;  %s37_s20 = sadd.s32 1, %s1431_s9 }
  0x5e   : > { %p56_p2 = scmp.ne.s32.totalorder %s1423_s29, %s1419_s28  ;;  %p38_p8 = scmp.ge.s32.totalorder %s37_s20, 3 }
  0x5f   : > { %p57_p12 = scmp.eq.s32.totalorder %s1435_s10, 0  ;;  %p1867_p6 = scmp.ne.s32.totalorder %s1860_s14, 0 }
  0x60   : > { %p1134_p3 = scmp.lt.s32.totalorder %s1435_s10, 3  ;;  %s1886_s20 = smov (%p38_p8, %s37_s20), 0 }
  0x61   : > { %p1655_p0 = por %p1867_p6, %p56_p2  ;;  %p58_p5 = por %p57_p12, %p56_p2 }
  0x62   : > { %s314_s8 = sand.u32 1, %s1423_s29   ;;  %s44_s27 = ssub.s32 %s1431_s9, %s1886_s20 }
  0x63   : > { %p47_p7 = scmp.eq.s32.totalorder %s44_s27, 0  ;;  %s845_s24 = sshll.u32 %s314_s8, 3 }
  0x64   : > { %s846_s26 = sshll.u32 %s1431_s9, 7  ;;  %s318_s23 = scalar_lea.vmem [#allocation3], %s845_s24 }
  0x65   : > { %s1667_s11 = scalar_select %p47_p7, %s1423_s29, %s49_s16  }
  0x66   : > { %s1672_s21 = scalar_lea.hbm %s1837_s0, %s846_s26  ;;  %s326_s25 = sshll.u32 %s318_s23, 4  ;;  %s1674_s25 = int_to_ptr.vmem [resolvable:$true] %s326_s25 }
  0x67   : > { %p1678_p10 = pnand %p1134_p3, %p58_p5  ;;  %s315_s22 = scalar_lea.sflag [#allocation4], %s314_s8 }
  0x68   : > { %s1285_s6 = scalar_lea.hbm %s1672_s21, 128  ;;  %s1290_s24 = scalar_lea.hbm %s1837_s0, 384 }
  0x69   : > { %p1286_p9 = scmp.ne.s32.totalorder %s1672_s21, %s1285_s6  ;;  %p1287_p11 = pneg %p1678_p10 }
  0x6a   : > { %p1291_p4 = scmp.lt.u32.totalorder %s1672_s21, %s1837_s0  ;;  %p1292_p2 = scmp.lt.u32.totalorder %s1290_s24, %s1285_s6 }
  0x6b   : > { %p1288_p13 = pnand %p1287_p11, %p1286_p9  ;;  %p1294_p12 = scmp.lt.u32.totalorder %s1285_s6, %s1672_s21 }
  0x6c   : > { %p1293_p8 = por %p1292_p2, %p1291_p4 }
  0x6d   : > { %p1289_p1 = pneg %p1288_p13 }
  0x6e   : > { %p1295_p6 = por %p1294_p12, %p1293_p8 }
  0x70   : > { %p1296_p3 = pnand %p1295_p6, %p1289_p1 }
  0x72   : > { %1299 = shalt.err (!%p1296_p3)
}
  0x73   : > { %s1300_s8 = scalar_lea.vmem %s1674_s25, 128  ;;  %s1442_s18 = smov [#allocation3]  }
  0x74   : > { %p1301_p5 = scmp.ne.s32.totalorder %s1674_s25, %s1300_s8  ;;  %s1305_s23 = sshll.u32 %s1442_s18, 4  ;;  %s1306_s23 = int_to_ptr.vmem [resolvable:$false] %s1305_s23 }
  0x75   : > { %s1307_s16 = scalar_lea.vmem %s1306_s23, 256  ;;  %p1308_p13 = scmp.lt.s32.totalorder %s1674_s25, %s1306_s23 }
  0x76   : > { %p1303_p7 = pnand %p1301_p5, %p1287_p11  ;;  %p1309_p4 = scmp.lt.s32.totalorder %s1307_s16, %s1300_s8 }
  0x78   : > { %p1304_p9 = pneg %p1303_p7  ;;  %p1310_p2 = por %p1309_p4, %p1308_p13 }
  0x7a   : > { %p1311_p8 = pnand %p1310_p2, %p1304_p9 }
  0x7c   : > { %1314 = shalt.err (!%p1311_p8)
}
  0x7d   : > { %1126 = dma.hbm_to_vmem [thread:$0]  (!%p1678_p10), %s1672_s21, 128, %s1674_s25, %s315_s22  }
  0x7e   : > { %p1870_p1 = scmp.ne.s32.totalorder %s1864_s17, 0 }
  0x7f   : > { %s1710_s6 = sand.u32 (!%p1870_p1), 1, %s1419_s28   ;;  %p1871_p11 = scmp.ne.s32.totalorder (!%p1870_p1), %s1861_s15, 0 }
  0x80   : > { %335 = sbr.rel (%p1870_p1) target bundleno = 731 (0x2db), region = 48  ;;  %s848_s27 = sshll.u32 (!%p1870_p1), %s1710_s6, 3 }
  0x81   : > { %s338_s24 = scalar_lea.sflag (!%p1870_p1), [#allocation4], %s1710_s6  ;;  %s1716_s26 = scalar_lea.vmem (!%p1870_p1), [#allocation3], %s848_s27 }
  0x87   : > { %1394 = dma.done.wait (%p1871_p11), %s338_s24, 128  }
  0x88   : > { %1396 = vsyncadd (%p1871_p11), %s338_s24, 4294967168  ;;  %p1872_p10 = scmp.ne.s32.totalorder %s1859_s13, 0 }
  0x8a   : > { %1398 = dma.done.wait (%p1872_p10), [#allocation7], 4096  }
  0x8b   : > { %1400 = vsyncadd (%p1872_p10), [#allocation7], 4294963200 }
  0x8c   : > { %1402 = dma.done.wait (%p1872_p10), [#allocation10], 2048  }
  0x8d   : > { %1404 = vsyncadd (%p1872_p10), [#allocation10], 4294965248  ;;  %v1443_v0 = vmov 0.0|0.0   ;;  %vm1444_vm0 = vmmov 0   ;;  %v1445_v1 = vmov 0.0   ;;  %v387_v2 = vld [vmem:[#allocation6] sm:$0xff] }
  0x8e   : > { %1021 = vmatprep.subr.bf16.mxu0 %v1443_v0  ;;  %948 = vmatprep.mubr.msk.f32.mxu0 %vm1444_vm0, %v1445_v1  ;;  %v388_v3 = vld [vmem:[#allocation6 + $0x8] sm:$0xff]  ;;  %v389_v4 = vld [vmem:[#allocation6 + $0x10] sm:$0xff]  ;;  %v390_v6 = vld [vmem:[#allocation6 + $0x18] sm:$0xff]  ;;  %s1746_s17 = scalar_lea.vmem [#allocation12], %s848_s27  ;;  %p854_p12 = scmp.ne.s32.totalorder %s1427_s30, 0 }
  0x8f   : > { %v1022_v5 = vpack.c.bf16 %v388_v3, %v387_v2  ;;  %v1025_v7 = vpack.c.bf16 %v390_v6, %v389_v4  ;;  %v391_v8 = vld [vmem:[#allocation6 + $0x20] sm:$0xff]  ;;  %v392_v9 = vld [vmem:[#allocation6 + $0x28] sm:$0xff]  ;;  %v393_v11 = vld [vmem:[#allocation6 + $0x30] sm:$0xff] }
  0x90   : > { %v1028_v10 = vpack.c.bf16 %v392_v9, %v391_v8  ;;  %v394_v12 = vld [vmem:[#allocation6 + $0x38] sm:$0xff]  ;;  %v395_v14 = vld [vmem:[#allocation6 + $0x40] sm:$0xff]  ;;  %v396_v15 = vld [vmem:[#allocation6 + $0x48] sm:$0xff] }
  0x91   : > { %1023 = vmatpush3.bf16.msra.mxu0 %v1022_v5  ;;  %v1031_v13 = vpack.c.bf16 %v394_v12, %v393_v11  ;;  %v1034_v16 = vpack.c.bf16 %v396_v15, %v395_v14  ;;  %v397_v17 = vld [vmem:[#allocation6 + $0x50] sm:$0xff]  ;;  %v398_v18 = vld [vmem:[#allocation6 + $0x58] sm:$0xff]  ;;  %v399_v20 = vld [vmem:[#allocation6 + $0x60] sm:$0xff] }
  0x92   : > { %1024 = vmatprep.subr.bf16.mxu0 %v1443_v0  ;;  %v1037_v19 = vpack.c.bf16 %v398_v18, %v397_v17  ;;  %v400_v21 = vld [vmem:[#allocation6 + $0x68] sm:$0xff]  ;;  %v401_v23 = vld [vmem:[#allocation6 + $0x70] sm:$0xff]  ;;  %v402_v24 = vld [vmem:[#allocation6 + $0x78] sm:$0xff] }
  0x93   : > { %v1040_v22 = vpack.c.bf16 %v400_v21, %v399_v20  ;;  %v1043_v25 = vpack.c.bf16 %v402_v24, %v401_v23  ;;  %v386_v26 = vld [vmem:[%s1716_s26] sm:$0xff]  ;;  %v853_v27 = vld [vmem:[%s1839_s2] ss:$0 sm:$0xff] }
  0x95   : > { %1026 = vmatpush3.bf16.msra.mxu0 %v1025_v7 }
  0x96   : > { %1027 = vmatprep.subr.bf16.mxu0 %v1443_v0 }
  0x99   : > { %1029 = vmatpush3.bf16.msra.mxu0 %v1028_v10 }
  0x9a   : > { %1030 = vmatprep.subr.bf16.mxu0 %v1443_v0 }
  0x9d   : > { %1032 = vmatpush3.bf16.msra.mxu0 %v1031_v13 }
  0x9e   : > { %1033 = vmatprep.subr.bf16.mxu0 %v1443_v0 }
  0xa1   : > { %1035 = vmatpush3.bf16.msra.mxu0 %v1034_v16 }
  0xa2   : > { %1036 = vmatprep.subr.bf16.mxu0 %v1443_v0 }
  0xa5   : > { %1038 = vmatpush3.bf16.msra.mxu0 %v1037_v19 }
  0xa6   : > { %1039 = vmatprep.subr.bf16.mxu0 %v1443_v0 }
  0xa9   : > { %1041 = vmatpush3.bf16.msra.mxu0 %v1040_v22 }
  0xaa   : > { %1042 = vmatprep.subr.bf16.mxu0 %v1443_v0 }
  0xad   : > { %1044 = vmatpush3.bf16.msra.mxu0 %v1043_v25 }
  0xb0   : > { %949 = vmatmul.mubr.f32.vlgmr.msra.gmra.mrb[0].mxu0 %v386_v26 }
 0x180   : > { %484 = sbr.rel (%p854_p12) target bundleno = 393 (0x189), region = 68 }
 0x183   : > { %v476_v28 = vpop.f32.mrb[0].mxu0 }
 0x184   : > { %v477_v29 = vadd.f32 %v853_v27, %v476_v28  ;;  %v950_v30 = vpop.f32.mrb[1].mxu0 }
 0x186   : > { %v480_v31 = vmax.f32 %v477_v29, 0.0 }
 0x188   : > { %485 = vst [vmem:[#allocation2] sm:$0xff] %v480_v31 }
 0x189 PF: > { %p855_p6 = scmp.le.s32.totalorder %s1427_s30, 0 }
 0x18b   : > { %489 = sbr.rel (%p855_p6) target bundleno = 403 (0x193), region = 72 }
 0x18f   : > { %v490_v32 = vld [vmem:[#allocation2] sm:$0xff] (!%p855_p6) }
 0x190   : > { %v491_v33 = vadd.f32 (!%p855_p6), %v490_v32, %v480_v31 }
 0x192   : > { %492 = vst [vmem:[#allocation2] sm:$0xff] %v491_v33 }
 0x193 PF: > { %1045 = vmatprep.subr.bf16.mxu1 %v1443_v0  ;;  %v493_v34 = vld [vmem:[#allocation8] sm:$0xff]  ;;  %v494_v35 = vld [vmem:[#allocation8 + $0x8] sm:$0xff]  ;;  %v495_v36 = vld [vmem:[#allocation8 + $0x10] sm:$0xff]  ;;  %983 = vmatprep.mubr.msk.f32.mxu1 %vm1444_vm0, %v1445_v1  ;;  %p857_p3 = scmp.ne.s32.totalorder %s1427_s30, 2 }
 0x194   : > { %v1046_v37 = vpack.c.bf16 %v494_v35, %v493_v34  ;;  %v496_v38 = vld [vmem:[#allocation8 + $0x18] sm:$0xff]  ;;  %v497_v40 = vld [vmem:[#allocation8 + $0x20] sm:$0xff]  ;;  %v498_v41 = vld [vmem:[#allocation8 + $0x28] sm:$0xff]  ;;  %v1446_v2 = vmov (!%p857_p3), 0.0|0.0   ;;  %vm1447_vm1 = vmmov (!%p857_p3), 0   ;;  %v1448_v4 = vmov (!%p857_p3), 0.0  }
 0x195   : > { %v1049_v39 = vpack.c.bf16 %v496_v38, %v495_v36  ;;  %v1052_v42 = vpack.c.bf16 %v498_v41, %v497_v40  ;;  %v499_v43 = vld [vmem:[#allocation8 + $0x30] sm:$0xff]  ;;  %v500_v44 = vld [vmem:[#allocation8 + $0x38] sm:$0xff]  ;;  %v501_v46 = vld [vmem:[#allocation8 + $0x40] sm:$0xff]  ;;  %1069 = vmatprep.subr.bf16.mxu0 (!%p857_p3), %v1446_v2  ;;  %1018 = vmatprep.mubr.msk.f32.mxu0 (!%p857_p3), %vm1447_vm1, %v1448_v4  ;;  %s1873_s12 = sld [smem:[#allocation21_spill]] (!%p857_p3) }
 0x196   : > { %1047 = vmatpush3.bf16.msra.mxu1 %v1046_v37  ;;  %v1055_v45 = vpack.c.bf16 %v500_v44, %v499_v43  ;;  %v502_v47 = vld [vmem:[#allocation8 + $0x48] sm:$0xff]  ;;  %v503_v49 = vld [vmem:[#allocation8 + $0x50] sm:$0xff]  ;;  %v504_v50 = vld [vmem:[#allocation8 + $0x58] sm:$0xff] }
 0x197   : > { %1048 = vmatprep.subr.bf16.mxu1 %v1443_v0  ;;  %v1058_v48 = vpack.c.bf16 %v502_v47, %v501_v46  ;;  %v1061_v51 = vpack.c.bf16 %v504_v50, %v503_v49  ;;  %v505_v52 = vld [vmem:[#allocation8 + $0x60] sm:$0xff]  ;;  %v506_v53 = vld [vmem:[#allocation8 + $0x68] sm:$0xff]  ;;  %v507_v55 = vld [vmem:[#allocation8 + $0x70] sm:$0xff] }
 0x198   : > { %v1064_v54 = vpack.c.bf16 %v506_v53, %v505_v52  ;;  %v508_v56 = vld [vmem:[#allocation8 + $0x78] sm:$0xff]  ;;  %v856_v58 = vld [vmem:[%s1841_s4] ss:$0 sm:$0xff]  ;;  %v592_v62 = vld [vmem:[#allocation9] sm:$0xff] (!%p857_p3) }
 0x199   : > { %v1067_v57 = vpack.c.bf16 %v508_v56, %v507_v55  ;;  %v593_v63 = vld [vmem:[#allocation9 + $0x8] sm:$0xff] (!%p857_p3)  ;;  %v594_v1 = vld [vmem:[#allocation9 + $0x10] sm:$0xff] (!%p857_p3)  ;;  %v596_v6 = vld [vmem:[#allocation9 + $0x20] sm:$0xff] (!%p857_p3) }
 0x19a   : > { %1050 = vmatpush3.bf16.msra.mxu1 %v1049_v39  ;;  %v1070_v3 = vpack.c.bf16 (!%p857_p3), %v593_v63, %v592_v62  ;;  %v597_v7 = vld [vmem:[#allocation9 + $0x28] sm:$0xff] (!%p857_p3)  ;;  %v598_v9 = vld [vmem:[#allocation9 + $0x30] sm:$0xff] (!%p857_p3)  ;;  %v599_v10 = vld [vmem:[#allocation9 + $0x38] sm:$0xff] (!%p857_p3) }
 0x19b   : > { %1051 = vmatprep.subr.bf16.mxu1 %v1443_v0  ;;  %v1076_v8 = vpack.c.bf16 (!%p857_p3), %v597_v7, %v596_v6  ;;  %v1079_v11 = vpack.c.bf16 (!%p857_p3), %v599_v10, %v598_v9  ;;  %v600_v12 = vld [vmem:[#allocation9 + $0x40] sm:$0xff] (!%p857_p3)  ;;  %v601_v13 = vld [vmem:[#allocation9 + $0x48] sm:$0xff] (!%p857_p3)  ;;  %v602_v15 = vld [vmem:[#allocation9 + $0x50] sm:$0xff] (!%p857_p3) }
 0x19c   : > { %1071 = vmatpush3.bf16.msra.mxu0 (!%p857_p3), %v1070_v3  ;;  %v1082_v14 = vpack.c.bf16 (!%p857_p3), %v601_v13, %v600_v12  ;;  %v603_v16 = vld [vmem:[#allocation9 + $0x58] sm:$0xff] (!%p857_p3)  ;;  %v604_v18 = vld [vmem:[#allocation9 + $0x60] sm:$0xff] (!%p857_p3)  ;;  %v605_v19 = vld [vmem:[#allocation9 + $0x68] sm:$0xff] (!%p857_p3) }
 0x19d   : > { %1072 = vmatprep.subr.bf16.mxu0 (!%p857_p3), %v1446_v2  ;;  %v1085_v17 = vpack.c.bf16 (!%p857_p3), %v603_v16, %v602_v15  ;;  %v1088_v20 = vpack.c.bf16 (!%p857_p3), %v605_v19, %v604_v18  ;;  %v606_v21 = vld [vmem:[#allocation9 + $0x70] sm:$0xff] (!%p857_p3)  ;;  %v607_v22 = vld [vmem:[#allocation9 + $0x78] sm:$0xff] (!%p857_p3)  ;;  %v591_v24 = vld [vmem:[#allocation2] sm:$0xff] (!%p857_p3) }
 0x19e   : > { %1053 = vmatpush3.bf16.msra.mxu1 %v1052_v42  ;;  %v1091_v23 = vpack.c.bf16 (!%p857_p3), %v607_v22, %v606_v21  ;;  %v858_v25 = vld [vmem:[%s1873_s12] ss:$0 sm:$0xff] (!%p857_p3) }
 0x19f   : > { %1054 = vmatprep.subr.bf16.mxu1 %v1443_v0 }
 0x1a2   : > { %1056 = vmatpush3.bf16.msra.mxu1 %v1055_v45 }
 0x1a3   : > { %1057 = vmatprep.subr.bf16.mxu1 %v1443_v0 }
 0x1a6   : > { %1059 = vmatpush3.bf16.msra.mxu1 %v1058_v48 }
 0x1a7   : > { %1060 = vmatprep.subr.bf16.mxu1 %v1443_v0 }
 0x1aa   : > { %1062 = vmatpush3.bf16.msra.mxu1 %v1061_v51 }
 0x1ab   : > { %1063 = vmatprep.subr.bf16.mxu1 %v1443_v0 }
 0x1ae   : > { %1065 = vmatpush3.bf16.msra.mxu1 %v1064_v54 }
 0x1af   : > { %1066 = vmatprep.subr.bf16.mxu1 %v1443_v0  ;;  %v595_v0 = vld [vmem:[#allocation9 + $0x18] sm:$0xff] (!%p857_p3) }
 0x1b0   : > { %v1073_v5 = vpack.c.bf16 (!%p857_p3), %v595_v0, %v594_v1 }
 0x1b2   : > { %1068 = vmatpush3.bf16.msra.mxu1 %v1067_v57  ;;  %1074 = vmatpush3.bf16.msra.mxu0 (!%p857_p3), %v1073_v5 }
 0x1b3   : > { %1075 = vmatprep.subr.bf16.mxu0 (!%p857_p3), %v1446_v2 }
 0x1b5   : > { %984 = vmatmul.mubr.f32.vlgmr.msra.gmra.mrb[0].mxu1 %v480_v31 }
 0x1b6   : > { %1077 = vmatpush3.bf16.msra.mxu0 (!%p857_p3), %v1076_v8 }
 0x1b7   : > { %1078 = vmatprep.subr.bf16.mxu0 (!%p857_p3), %v1446_v2 }
 0x1ba   : > { %1080 = vmatpush3.bf16.msra.mxu0 (!%p857_p3), %v1079_v11 }
 0x1bb   : > { %1081 = vmatprep.subr.bf16.mxu0 (!%p857_p3), %v1446_v2 }
 0x1be   : > { %1083 = vmatpush3.bf16.msra.mxu0 (!%p857_p3), %v1082_v14 }
 0x1bf   : > { %1084 = vmatprep.subr.bf16.mxu0 (!%p857_p3), %v1446_v2 }
 0x1c2   : > { %1086 = vmatpush3.bf16.msra.mxu0 (!%p857_p3), %v1085_v17 }
 0x1c3   : > { %1087 = vmatprep.subr.bf16.mxu0 (!%p857_p3), %v1446_v2 }
 0x1c6   : > { %1089 = vmatpush3.bf16.msra.mxu0 (!%p857_p3), %v1088_v20 }
 0x1c7   : > { %1090 = vmatprep.subr.bf16.mxu0 (!%p857_p3), %v1446_v2 }
 0x1ca   : > { %1092 = vmatpush3.bf16.msra.mxu0 (!%p857_p3), %v1091_v23 }
 0x1cd   : > { %1019 = vmatmul.mubr.f32.vlgmr.msra.gmra.mrb[0].mxu0 (!%p857_p3), %v591_v24 }
 0x285   : > { %590 = sbr.rel (%p857_p3) target bundleno = 676 (0x2a4), region = 76 }
 0x288   : > { %v582_v59 = vpop.f32.mrb[0].mxu1 }
 0x289   : > { %v583_v60 = vadd.f32 %v856_v58, %v582_v59  ;;  %v985_v61 = vpop.f32.mrb[1].mxu1 }
 0x28b   : > { %586 = vst [vmem:[%s1746_s17] sm:$0xff] %v583_v60 }
 0x2a0   : > { %v681_v26 = vpop.f32.mrb[0].mxu0 }
 0x2a1   : > { %v682_v27 = vadd.f32 %v858_v25, %v681_v26  ;;  %v1020_v28 = vpop.f32.mrb[1].mxu0 }
 0x2a3   : > { %685 = vst [vmem:[#allocation11] sm:$0xff] %v682_v27 }
 0x2a4 PF: > { %s1449_s8 = smov [#allocation11]   ;;  %s861_s23 = sshll.u32 %s1427_s30, 7 }
 0x2a5   : > { %s700_s18 = sshll.u32 %s1449_s8, 4  ;;  %p1874_p7 = scmp.ne.s32.totalorder %s1860_s14, 0  ;;  %s701_s18 = int_to_ptr.vmem [resolvable:$true] %s700_s18 }
 0x2a6   : > { %s1315_s16 = scalar_lea.vmem %s701_s18, 128  ;;  %p1322_p4 = scmp.lt.s32.totalorder %s701_s18, %s701_s18 }
 0x2a7   : > { %p1316_p5 = scmp.ne.s32.totalorder %s701_s18, %s1315_s16  ;;  %p1323_p2 = scmp.lt.s32.totalorder %s1315_s16, %s1315_s16 }
 0x2a9   : > { %p1317_p9 = pnand %p1316_p5, %p1874_p7  ;;  %p1324_p8 = por %p1323_p2, %p1322_p4 }
 0x2ab   : > { %p1318_p13 = pneg %p1317_p9 }
 0x2ad   : > { %p1325_p1 = pnand %p1324_p8, %p1318_p13 }
 0x2af   : > { %1328 = shalt.err (!%p1325_p1)
}
 0x2b0   : > { %s1875_s26 = sld [smem:[#allocation22_spill]] }
 0x2b6   : > { %s1329_s13 = scalar_lea.hbm %s1875_s26, 128 }
 0x2b7   : > { %p1330_p11 = scmp.ne.s32.totalorder %s1875_s26, %s1329_s13  ;;  %p1335_p6 = scmp.lt.u32.totalorder %s1329_s13, %s1875_s26 }
 0x2b9   : > { %p1331_p10 = pnand %p1330_p11, %p1874_p7 }
 0x2bb   : > { %p1332_p12 = pneg %p1331_p10 }
 0x2bd   : > { %p1337_p3 = pnand %p1335_p6, %p1332_p12 }
 0x2bf   : > { %1340 = shalt.err (!%p1337_p3)
}
 0x2c0   : > { %1108 = dma.vmem_to_hbm [thread:$0]  (%p1874_p7), %s701_s18, 128, %s1875_s26, [#allocation5]  }
 0x2c1   : > { %s1876_s16 = sld [smem:[#allocation23_spill]]  ;;  %s714_s24 = sshll.u32 %s1746_s17, 4  ;;  %s715_s24 = int_to_ptr.vmem [resolvable:$true] %s714_s24 }
 0x2c2   : > { %s687_s15 = scalar_lea.sflag [#allocation13], %s1710_s6  ;;  %s1341_s13 = scalar_lea.vmem %s715_s24, 128 }
 0x2c3   : > { %p1342_p5 = scmp.ne.s32.totalorder %s715_s24, %s1341_s13  ;;  %s1450_s21 = smov [#allocation12]  }
 0x2c4   : > { %s1345_s30 = sshll.u32 %s1450_s21, 4  ;;  %s1346_s30 = int_to_ptr.vmem [resolvable:$false] %s1345_s30 }
 0x2c5   : > { %p1343_p9 = pnand %p1342_p5, %p1655_p0  ;;  %s1347_s25 = scalar_lea.vmem %s1346_s30, 256 }
 0x2c6   : > { %p1348_p4 = scmp.lt.s32.totalorder %s715_s24, %s1346_s30  ;;  %p1349_p2 = scmp.lt.s32.totalorder %s1347_s25, %s1341_s13 }
 0x2c7   : > { %s1790_s27 = scalar_lea.hbm %s1876_s16, %s861_s23  ;;  %p1344_p13 = pneg %p1343_p9 }
 0x2c8   : > { %p1350_p8 = por %p1349_p2, %p1348_p4 }
 0x2ca   : > { %p1351_p1 = pnand %p1350_p8, %p1344_p13 }
 0x2cc   : > { %1354 = shalt.err (!%p1351_p1)
}
 0x2cd   : > { %s1355_s6 = scalar_lea.hbm %s1790_s27, 128  ;;  %s1359_s23 = scalar_lea.hbm %s1876_s16, 384 }
 0x2ce   : > { %p1356_p11 = scmp.ne.s32.totalorder %s1790_s27, %s1355_s6  ;;  %p1360_p6 = scmp.lt.u32.totalorder %s1790_s27, %s1876_s16 }
 0x2cf   : > { %p1361_p3 = scmp.lt.u32.totalorder %s1359_s23, %s1355_s6  ;;  %p1363_p9 = scmp.lt.u32.totalorder %s1355_s6, %s1790_s27 }
 0x2d0   : > { %p1357_p10 = pnand %p1356_p11, %p1655_p0 }
 0x2d1   : > { %p1362_p5 = por %p1361_p3, %p1360_p6 }
 0x2d2   : > { %p1358_p12 = pneg %p1357_p10 }
 0x2d3   : > { %p1364_p13 = por %p1363_p9, %p1362_p5 }
 0x2d5   : > { %p1365_p4 = pnand %p1364_p13, %p1358_p12 }
 0x2d7   : > { %1368 = shalt.err (!%p1365_p4)
}
 0x2d8   : > { %1109 = dma.vmem_to_hbm [thread:$0]  (%p1655_p0), %s715_s24, 128, %s1790_s27, %s687_s15  }
 0x2d9   : > { %1406 = dma.done.wait (%p1874_p7), [#allocation5], 128  }
 0x2da   : > { %1408 = vsyncadd (%p1874_p7), [#allocation5], 4294967168 }
 0x2db PF: > { %s1877_s12 = sld [smem:[#allocation19_spill]]  ;;  %s1878_s8 = sld [smem:[#allocation20_spill]] }
 0x2dc   : > { %p1140_p2 = scmp.ge.s32.totalorder %s1435_s10, 2 }
 0x2e1   : > { %s730_s13 = sand.u32 1, %s1877_s12   ;;  %p1879_p8 = scmp.ne.s32.totalorder %s1878_s8, 0 }
 0x2e2   : > { %s731_s21 = scalar_lea.sflag [#allocation13], %s730_s13 }
 0x2e3   : > { %p1128_p1 = pnand %p1140_p2, %p1879_p8 }
 0x2e5   : > { %1410 = dma.done.wait (!%p1128_p1), %s731_s21, 128  }
 0x2e6   : > { %1412 = vsyncadd (!%p1128_p1), %s731_s21, 4294967168  ;;  %s28_s10 = sadd.s32 1, %s1435_s10   ;;  %s1880_s27 = smov %s1419_s28 }
 0x2e7   : > { %p25_p11 = scmp.ge.s32.totalorder %s28_s10, 5   ;;  %s1881_s28 = smov %s1423_s29 }
 0x2e8   : > { %s1882_s29 = smov %s1667_s11  ;;  %s1883_s30 = smov %s1431_s9 }
 0x2e9   : > { %s1884_s9 = smov %s1886_s20  ;;  %27 = sbr.rel (!%p25_p11) target bundleno = 13 (0xd), region = 127 }
 0x2f0   :  { %736 = vsyncpa [#allocation4], 1 }
 0x2f1   :  { %738 = vsyncpa [#allocation4 + $0x1], 1 }
 0x2f2   :  { %739 = vsyncpa [#allocation7], 1 }
 0x2f3   :  { %740 = vsyncpa [#allocation10], 1 }
 0x2f4   :  { %741 = vsyncpa [#allocation5], 1 }
 0x2f5   :  { %743 = vsyncpa [#allocation5 + $0x1], 1 }
 0x2f6   :  { %744 = vsyncpa [#allocation13], 1 }
 0x2f7   :  { %746 = vsyncpa [#allocation13 + $0x1], 1 }

</bundles_post_ra>
